<compile_context>
chip_gen: v7x
topology: tpu7x:2x2x1
jax: 0.10.0
libtpu: 0.0.40
codegen_flags: <defaults>
</compile_context>

<pallas_src>
import jax
import jax.numpy as jnp
from jax.experimental import pallas as pl
from jax.experimental.pallas import tpu as pltpu

_LANES = 512        # lane-dense last dim (4 x 128)  -> unmasked vector stores
_TILE_ROWS = 1024   # 1024 x 512 x 4B = 2 MiB/buffer (f32); 2x(in+out) = 8 MiB VMEM


def _clone_kernel(x_ref, o_ref):
    # Straight VMEM copy of one lane-dense row tile — the "clone" hot path.
    o_ref[...] = x_ref[...]


def _pallas_clone(x):
    """Fresh-buffer clone of an arbitrary-shaped tensor via a lane-dense,
    row-tiled Pallas copy kernel (pure HBM-bandwidth memcpy)."""
    orig_shape = x.shape
    flat = x.reshape(-1)
    n = flat.shape[0]

    # Pad the flat view up to a multiple of the lane width so the 2-D view is
    # exactly lane-dense; the (small) tail is sliced off after the kernel.
    pad = (-n) % _LANES
    if pad:
        flat = jnp.pad(flat, (0, pad))
    rows = flat.shape[0] // _LANES
    x2d = flat.reshape(rows, _LANES)

    if rows <= _TILE_ROWS:
        # Single block covering the full array: always a legal block shape.
        tile_rows = rows
    else:
        # Large tiles (multiple of 8 sublanes / 128 lanes) to amortize the
        # ~0.35 us per-grid-step overhead; partial last tile is masked by
        # Pallas automatically.
        tile_rows = _TILE_ROWS

    grid = (pl.cdiv(rows, tile_rows),)

    out2d = pl.pallas_call(
        _clone_kernel,
        out_shape=jax.ShapeDtypeStruct((rows, _LANES), x.dtype),
        grid=grid,
        in_specs=[pl.BlockSpec((tile_rows, _LANES), lambda i: (i, 0))],
        out_specs=pl.BlockSpec((tile_rows, _LANES), lambda i: (i, 0)),
        compiler_params=pltpu.CompilerParams(
            dimension_semantics=("parallel",)),
    )(x2d)

    out_flat = out2d.reshape(-1)
    if pad:
        out_flat = out_flat[:n]
    return out_flat.reshape(orig_shape)


def anim_transform_forward(data, *, parallel_out=False, pass_along=True,
                           clone=False):
    """JAX re-implementation of `_AnimTransform.forward`.

    `data` is either a jnp array or a dict containing key 'x' plus extra
    metadata.  The base-class `transform()` is abstract, so the transform
    applied here is the identity; only `clone=True` runs the Pallas copy
    kernel (clone=False passes the tensor through untouched).
    """
    if isinstance(data, dict):
        x = data['x']
        kwargs = {k: v for k, v in data.items() if k != 'x'}
    else:
        x = data
        kwargs = {}

    if clone:
        # Functional `.clone()`: force a fresh buffer via the Pallas copy.
        x = _pallas_clone(x)

    if x.ndim == 2:
        x = x[None, ...]  # matches `x = x[None, ...]`

    # ---- transform() is abstract -> identity (no extra HBM traffic). ----
    out = {'x': x}

    if pass_along:
        for k, v in out.items():
            kwargs[k] = v
        if len(kwargs) == 1:
            return kwargs['x']
        return kwargs
    elif len(out) == 1:
        return out['x']
    return out


if __name__ == "__main__":
    key = jax.random.PRNGKey(0)
    k1, k2 = jax.random.split(key)

    # 3-D input: [batch=2, frames=16, feature=32] — clone=True runs the kernel.
    x3 = jax.random.normal(k1, (2, 16, 32), dtype=jnp.float32)
    y3 = jax.block_until_ready(anim_transform_forward(x3, clone=True))
    assert y3.shape == (2, 16, 32)
    assert jnp.allclose(y3, x3)

    # 2-D input (gets unsqueezed to [1, T, D]); clone=False bypasses the kernel.
    x2 = jax.random.normal(k2, (8, 32), dtype=jnp.float32)
    y2 = jax.block_until_ready(anim_transform_forward(x2))
    assert y2.shape == (1, 8, 32)
    assert jnp.allclose(y2[0], x2)

    # dict input with extra metadata passed along (kernel clone path again).
    d = {'x': x3, 'fps': jnp.asarray(30.0)}
    out = anim_transform_forward(d, clone=True)
    out_x = jax.block_until_ready(out['x'])
    assert set(out.keys()) == {'x', 'fps'}
    assert jnp.allclose(out_x, x3)

    print("KERNEL_OK")
</pallas_src>

<mosaic_0001>
module attributes {stable_mosaic.version = 11 : i64} {
  func.func @_clone_kernel(%arg0: i32, %arg1: memref<2x512xf32, #tpu.memory_space<vmem>>, %arg2: memref<2x512xf32, #tpu.memory_space<vmem>>) attributes {dimension_semantics = [#tpu.dimension_semantics<parallel>], iteration_bounds = array<i64: 1>, scalar_prefetch = 0 : i64, scratch_operands = 0 : i64, tpu.core_type = #tpu.core_type<tc>, window_params = [{transform_indices = @transform_0, window_bounds = array<i64: 2, 512>}, {transform_indices = @transform_1, window_bounds = array<i64: 2, 512>}]} {
    %c0 = arith.constant 0 : index
    %c0_0 = arith.constant 0 : index
    %0 = vector.load %arg1[%c0, %c0_0] : memref<2x512xf32, #tpu.memory_space<vmem>>, vector<2x512xf32>
    %c0_1 = arith.constant 0 : index
    %c0_2 = arith.constant 0 : index
    %1 = vector.load %arg2[%c0_1, %c0_2] : memref<2x512xf32, #tpu.memory_space<vmem>>, vector<2x512xf32>
    tpu.vector_store %arg2[%c0_1, %c0_2], %0 {strides = array<i32>} : memref<2x512xf32, #tpu.memory_space<vmem>>, vector<2x512xf32>,
    return
  }
  func.func @transform_0(%arg0: i32) -> (i32, i32) {
    %c0_i32 = arith.constant 0 : i32
    %c0_i32_0 = arith.constant 0 : i32
    return %arg0, %c0_i32 : i32, i32
  }
  func.func @transform_1(%arg0: i32) -> (i32, i32) {
    %c0_i32 = arith.constant 0 : i32
    %c0_i32_0 = arith.constant 0 : i32
    return %arg0, %c0_i32 : i32, i32
  }
}

</mosaic_0001>

<bundles_post_ra>
// kernel: tpu_custom_call.1
= control target key start
LH: loop header
LB: loop body
LE: loop exit
PB: predicated region body
PF: predicated region fallthrough
CT: control target
= control target key end

     0   :  { %6 = vsyncpa [#allocation3], 0  ;;  %s124_s0 = inlined_call_operand.hbm [shape: f32[2,512], index: 0, kind: input, shape index: {}]   ;;  %s125_s1 = inlined_call_operand.hbm [shape: f32[2,512], index: 1, kind: output, shape index: {}]  }
   0x1   :  { %7 = vsyncpa [#allocation4], 0  ;;  %s88_s6 = smov [#allocation2]   ;;  %s40_s10 = scalar_lea.hbm %s124_s0, 128 }
   0x2   :  { %s14_s7 = sshll.u32 %s88_s6, 4  ;;  %p41_p0 = scmp.ne.s32.totalorder %s124_s0, %s40_s10  ;;  %s15_s7 = int_to_ptr.vmem [resolvable:$true] %s14_s7 }
   0x3   :  { %p44_p1 = scmp.lt.u32.totalorder %s40_s10, %s124_s0 }
   0x5   :  { %p46_p2 = pnand %p44_p1, %p41_p0 }
   0x7   :  { %49 = shalt.err (!%p46_p2)
}
   0x8   :  { %s50_s15 = scalar_lea.vmem %s15_s7, 128  ;;  %p55_p4 = scmp.lt.s32.totalorder %s15_s7, %s15_s7 }
   0x9   :  { %p51_p3 = scmp.ne.s32.totalorder %s15_s7, %s50_s15  ;;  %p56_p5 = scmp.lt.s32.totalorder %s50_s15, %s50_s15 }
   0xb   :  { %p57_p6 = por %p56_p5, %p55_p4 }
   0xd   :  { %p58_p7 = pnand %p57_p6, %p51_p3 }
   0xf   :  { %61 = shalt.err (!%p58_p7)
}
  0x10   :  { %17 = dma.hbm_to_vmem [thread:$0]  %s124_s0, 128, %s15_s7, [#allocation3]  }
  0x11   :  { %84 = dma.done.wait [#allocation3], 128  }
  0x12   :  { %85 = vsyncadd [#allocation3], 4294967168  ;;  %s89_s18 = smov [#allocation5]   ;;  %v21_v0 = vld [vmem:[#allocation2] sm:$0xff] }
  0x13   :  { %s29_s19 = sshll.u32 %s89_s18, 4  ;;  %22 = vst [vmem:[#allocation5] sm:$0xff] %v21_v0  ;;  %s30_s19 = int_to_ptr.vmem [resolvable:$true] %s29_s19 }
  0x14   :  { %s62_s20 = scalar_lea.vmem %s30_s19, 128  ;;  %p67_p9 = scmp.lt.s32.totalorder %s30_s19, %s30_s19 }
  0x15   :  { %p63_p8 = scmp.ne.s32.totalorder %s30_s19, %s62_s20  ;;  %p68_p10 = scmp.lt.s32.totalorder %s62_s20, %s62_s20 }
  0x17   :  { %p69_p11 = por %p68_p10, %p67_p9 }
  0x19   :  { %p70_p12 = pnand %p69_p11, %p63_p8 }
  0x1b   :  { %73 = shalt.err (!%p70_p12)
}
  0x1c   :  { %s74_s23 = scalar_lea.hbm %s125_s1, 128 }
  0x1d   :  { %p75_p13 = scmp.ne.s32.totalorder %s125_s1, %s74_s23  ;;  %p78_p0 = scmp.lt.u32.totalorder %s74_s23, %s125_s1 }
  0x1f   :  { %p80_p1 = pnand %p78_p0, %p75_p13 }
  0x21   :  { %83 = shalt.err (!%p80_p1)
}
  0x22   :  { %32 = dma.vmem_to_hbm [thread:$0]  %s30_s19, 128, %s125_s1, [#allocation4]  }
  0x23   :  { %86 = dma.done.wait [#allocation4], 128  }
  0x24   :  { %87 = vsyncadd [#allocation4], 4294967168 }
  0x25   :  { %36 = vsyncpa [#allocation3], 1 }
  0x26   :  { %37 = vsyncpa [#allocation4], 1 }

</bundles_post_ra>
